<compile_context>
chip_gen: v7x
topology: tpu7x:2x2x1
jax: 0.10.0
libtpu: 0.0.40
codegen_flags: <defaults>
</compile_context>

<pallas_src>
import functools
import math

import numpy as np
import jax
import jax.numpy as jnp
from jax import lax
from jax.experimental import pallas as pl
from jax.experimental.pallas import tpu as pltpu


# ----------------------------- fused Pallas kernel -----------------------------

def _dsconv_fused_kernel(x_ref, wdw_ref, bdw_ref, wpw_ref, bpw_ref, o_ref, *, K, W):
    """Fused depthwise(KxK, groups=Cin) + pointwise(1x1) conv for one image.

    Shapes (spatial flattened onto the lane axis):
      x_ref:   (1, Cin, Lx)    one NCHW image, rows flattened, zero-padded tail
      wdw_ref: (Cin, K*K)      depthwise weights, tap index t = ki*K + kj
      bdw_ref: (Cin, 1)        depthwise bias
      wpw_ref: (Cout, Cin)     pointwise weights
      bpw_ref: (Cout, 1)       pointwise bias
      o_ref:   (1, Cout, P)    wide output, P = Hp*W (multiple of 128 -> unmasked stores)
    """
    cin = x_ref.shape[1]
    P = o_ref.shape[-1]

    # Hoisted cast (no per-tap recast of the weights).
    w_dw = wdw_ref[...].astype(jnp.float32)            # (Cin, K*K)

    # Depthwise: 9 static-offset window loads from the resident input block.  The
    # lane shift of each tap is folded into the load itself, so no per-tap relayout
    # copy of a sliced value is materialized.
    acc = jnp.zeros((cin, P), jnp.float32)
    for ki in range(K):
        for kj in range(K):
            t = ki * K + kj
            d = ki * W + kj                             # static lane offset of tap t
            tap = x_ref[0, :, pl.ds(d, P)].astype(jnp.float32)   # (Cin, P)
            acc = acc + tap * w_dw[:, t:t + 1]          # per-channel scale (VPU)
    acc = acc + bdw_ref[...].astype(jnp.float32)        # (Cin, 1) broadcast

    # Pointwise 1x1 conv == channel contraction on the MXU; spatial stays on lanes,
    # so the (Cout, P) result is written with full-width lane-dense stores.
    out = jnp.dot(wpw_ref[...].astype(jnp.float32), acc,
                  preferred_element_type=jnp.float32)   # (Cout, P)
    out = out + bpw_ref[...].astype(jnp.float32)        # (Cout, 1) broadcast
    o_ref[0] = out.astype(o_ref.dtype)


# ------------------------------- wrapper ----------------------------------

def dsconv_forward(x_nchw, dw_w, dw_b, pw_w, pw_b):
    """DSConv forward.  x_nchw: (B, Cin, H, W); dw_w: (Cin, 1, K, K); dw_b: (Cin,);
    pw_w: (Cout, Cin, 1, 1); pw_b: (Cout,).  Returns (B, Cout, Ho, Wo) in NCHW."""
    B, Cin, H, W = x_nchw.shape
    K = dw_w.shape[-1]
    Ho, Wo = H - K + 1, W - K + 1
    Cout = pw_w.shape[0]

    # Pad the output-row count so the flattened output width Hp*W is a multiple of
    # 128 (full lane tiles, unmasked stores); padded rows are trimmed afterwards.
    g = 128 // math.gcd(128, W)
    Hp = -(-Ho // g) * g
    if Hp > max(2 * Ho, Ho + 8):        # don't blow up writeback for awkward widths
        Hp = Ho
    P = Hp * W                          # flattened (wide) output width per image
    d_max = (K - 1) * W + (K - 1)       # largest tap offset
    Lx = P + d_max                      # padded flattened input length per image

    # Flatten spatial onto the lane axis (stays NCHW: no transposes) and zero-pad the
    # tail so every tap window stays in bounds; the pad only feeds trimmed outputs.
    x_flat = jnp.pad(x_nchw.reshape(B, Cin, H * W),
                     ((0, 0), (0, 0), (0, Lx - H * W)))

    w_dw = dw_w[:, 0, :, :].reshape(Cin, K * K)         # (Cin, K*K), t = ki*K + kj
    b_dw = dw_b.reshape(Cin, 1)
    w_pw = pw_w[:, :, 0, 0]                             # (Cout, Cin)
    b_pw = pw_b.reshape(Cout, 1)

    kernel = functools.partial(_dsconv_fused_kernel, K=K, W=W)

    out_wide = pl.pallas_call(
        kernel,
        out_shape=jax.ShapeDtypeStruct((B, Cout, P), x_nchw.dtype),
        grid=(B,),
        in_specs=[
            pl.BlockSpec((1, Cin, Lx), lambda b: (b, 0, 0)),      # one image per step
            pl.BlockSpec((Cin, K * K), lambda b: (0, 0)),         # weights: resident
            pl.BlockSpec((Cin, 1), lambda b: (0, 0)),
            pl.BlockSpec((Cout, Cin), lambda b: (0, 0)),
            pl.BlockSpec((Cout, 1), lambda b: (0, 0)),
        ],
        out_specs=pl.BlockSpec((1, Cout, P), lambda b: (b, 0, 0)),
        compiler_params=pltpu.CompilerParams(
            dimension_semantics=("parallel",),       # batch steps are independent
            vmem_limit_bytes=32 * 1024 * 1024,       # explicit, fits v5e/v6e/v7x
        ),
    )(x_flat, w_dw, b_dw, w_pw, b_pw)

    # Wide lane-dense result -> valid NCHW output (trim padded rows / cols).
    return out_wide.reshape(B, Cout, Hp, W)[:, :, :Ho, :Wo]


# -------------------------- parameter initialization -----------------------

def init_dsconv_params(key, in_channels, out_channels, kernel_size=3):
    """Kaiming-uniform-like init (gain=sqrt(2), as in the PyTorch module); biases zero."""
    k_dw, k_pw = jax.random.split(key)
    fan_in_dw = kernel_size * kernel_size               # depthwise: 1 * K * K
    bound_dw = math.sqrt(6.0 / fan_in_dw)
    dw_w = jax.random.uniform(k_dw, (in_channels, 1, kernel_size, kernel_size),
                              jnp.float32, -bound_dw, bound_dw)
    dw_b = jnp.zeros((in_channels,), jnp.float32)
    bound_pw = math.sqrt(6.0 / in_channels)              # pointwise: fan_in = Cin
    pw_w = jax.random.uniform(k_pw, (out_channels, in_channels, 1, 1),
                              jnp.float32, -bound_pw, bound_pw)
    pw_b = jnp.zeros((out_channels,), jnp.float32)
    return dw_w, dw_b, pw_w, pw_b


# ------------------------------ reference -----------------------------------

def dsconv_reference(x_nchw, dw_w, dw_b, pw_w, pw_b):
    Cin = x_nchw.shape[1]
    dw = lax.conv_general_dilated(
        x_nchw, dw_w, window_strides=(1, 1), padding="VALID",
        feature_group_count=Cin,
        dimension_numbers=("NCHW", "OIHW", "NCHW"))
    dw = dw + dw_b[None, :, None, None]
    pw = jnp.einsum("oc,bchw->bohw", pw_w[:, :, 0, 0], dw)
    return pw + pw_b[None, :, None, None]


# --------------------------------- main -------------------------------------

if __name__ == "__main__":
    B, Cin, Cout, H, W = 2, 4, 8, 16, 16
    key = jax.random.PRNGKey(0)
    k_x, k_p = jax.random.split(key)

    x = jax.random.normal(k_x, (B, Cin, H, W), jnp.float32)
    dw_w, dw_b, pw_w, pw_b = init_dsconv_params(k_p, Cin, Cout, kernel_size=3)

    out = dsconv_forward(x, dw_w, dw_b, pw_w, pw_b)
    out = jax.block_until_ready(out)

    ref = dsconv_reference(x, dw_w, dw_b, pw_w, pw_b)
    assert out.shape == (B, Cout, H - 2, W - 2), out.shape
    err = float(np.max(np.abs(np.asarray(out) - np.asarray(ref))))
    assert np.allclose(np.asarray(out), np.asarray(ref), rtol=1e-4, atol=1e-4), err

    print("KERNEL_OK")
</pallas_src>

<mosaic_0001>
module attributes {stable_mosaic.version = 11 : i64} {
  func.func @_dsconv_fused_kernel(%arg0: i32, %arg1: memref<1x4x290xf32, #tpu.memory_space<vmem>>, %arg2: memref<4x9xf32, #tpu.memory_space<vmem>>, %arg3: memref<4x1xf32, #tpu.memory_space<vmem>>, %arg4: memref<8x4xf32, #tpu.memory_space<vmem>>, %arg5: memref<8x1xf32, #tpu.memory_space<vmem>>, %arg6: memref<1x8x256xf32, #tpu.memory_space<vmem>>) attributes {dimension_semantics = [#tpu.dimension_semantics<parallel>], iteration_bounds = array<i64: 2>, scalar_prefetch = 0 : i64, scratch_operands = 0 : i64, tpu.core_type = #tpu.core_type<tc>, window_params = [{transform_indices = @transform_0, window_bounds = array<i64: 1, 4, 290>}, {pipeline_mode = #tpu.pipeline_mode<synchronous>, transform_indices = @transform_1, window_bounds = array<i64: 4, 9>}, {pipeline_mode = #tpu.pipeline_mode<synchronous>, transform_indices = @transform_2, window_bounds = array<i64: 4, 1>}, {pipeline_mode = #tpu.pipeline_mode<synchronous>, transform_indices = @transform_3, window_bounds = array<i64: 8, 4>}, {pipeline_mode = #tpu.pipeline_mode<synchronous>, transform_indices = @transform_4, window_bounds = array<i64: 8, 1>}, {transform_indices = @transform_5, window_bounds = array<i64: 1, 8, 256>}]} {
    %c0 = arith.constant 0 : index
    %c0_0 = arith.constant 0 : index
    %0 = vector.load %arg2[%c0, %c0_0] : memref<4x9xf32, #tpu.memory_space<vmem>>, vector<4x9xf32>
    %cst = arith.constant 0.000000e+00 : f32
    %1 = vector.broadcast %cst : f32 to vector<4x256xf32>
    %c0_1 = arith.constant 0 : index
    %c0_2 = arith.constant 0 : index
    %c0_3 = arith.constant 0 : index
    %2 = vector.load %arg1[%c0_1, %c0_2, %c0_3] : memref<1x4x290xf32, #tpu.memory_space<vmem>>, vector<1x4x256xf32>
    %3 = vector.shape_cast %2 : vector<1x4x256xf32> to vector<4x256xf32>
    %4 = vector.extract_strided_slice %0 {offsets = [0, 0], sizes = [4, 1], strides = [1, 1]} : vector<4x9xf32> to vector<4x1xf32>
    %5 = vector.broadcast %4 : vector<4x1xf32> to vector<4x256xf32>
    %6 = arith.mulf %3, %5 : vector<4x256xf32>
    %7 = arith.addf %1, %6 : vector<4x256xf32>
    %c0_4 = arith.constant 0 : index
    %c0_5 = arith.constant 0 : index
    %c1 = arith.constant 1 : index
    %8 = vector.load %arg1[%c0_4, %c0_5, %c1] : memref<1x4x290xf32, #tpu.memory_space<vmem>>, vector<1x4x256xf32>
    %9 = vector.shape_cast %8 : vector<1x4x256xf32> to vector<4x256xf32>
    %10 = vector.extract_strided_slice %0 {offsets = [0, 1], sizes = [4, 1], strides = [1, 1]} : vector<4x9xf32> to vector<4x1xf32>
    %11 = vector.broadcast %10 : vector<4x1xf32> to vector<4x256xf32>
    %12 = arith.mulf %9, %11 : vector<4x256xf32>
    %13 = arith.addf %7, %12 : vector<4x256xf32>
    %c0_6 = arith.constant 0 : index
    %c0_7 = arith.constant 0 : index
    %c2 = arith.constant 2 : index
    %14 = vector.load %arg1[%c0_6, %c0_7, %c2] : memref<1x4x290xf32, #tpu.memory_space<vmem>>, vector<1x4x256xf32>
    %15 = vector.shape_cast %14 : vector<1x4x256xf32> to vector<4x256xf32>
    %16 = vector.extract_strided_slice %0 {offsets = [0, 2], sizes = [4, 1], strides = [1, 1]} : vector<4x9xf32> to vector<4x1xf32>
    %17 = vector.broadcast %16 : vector<4x1xf32> to vector<4x256xf32>
    %18 = arith.mulf %15, %17 : vector<4x256xf32>
    %19 = arith.addf %13, %18 : vector<4x256xf32>
    %c0_8 = arith.constant 0 : index
    %c0_9 = arith.constant 0 : index
    %c16 = arith.constant 16 : index
    %20 = vector.load %arg1[%c0_8, %c0_9, %c16] : memref<1x4x290xf32, #tpu.memory_space<vmem>>, vector<1x4x256xf32>
    %21 = vector.shape_cast %20 : vector<1x4x256xf32> to vector<4x256xf32>
    %22 = vector.extract_strided_slice %0 {offsets = [0, 3], sizes = [4, 1], strides = [1, 1]} : vector<4x9xf32> to vector<4x1xf32>
    %23 = vector.broadcast %22 : vector<4x1xf32> to vector<4x256xf32>
    %24 = arith.mulf %21, %23 : vector<4x256xf32>
    %25 = arith.addf %19, %24 : vector<4x256xf32>
    %c0_10 = arith.constant 0 : index
    %c0_11 = arith.constant 0 : index
    %c17 = arith.constant 17 : index
    %26 = vector.load %arg1[%c0_10, %c0_11, %c17] : memref<1x4x290xf32, #tpu.memory_space<vmem>>, vector<1x4x256xf32>
    %27 = vector.shape_cast %26 : vector<1x4x256xf32> to vector<4x256xf32>
    %28 = vector.extract_strided_slice %0 {offsets = [0, 4], sizes = [4, 1], strides = [1, 1]} : vector<4x9xf32> to vector<4x1xf32>
    %29 = vector.broadcast %28 : vector<4x1xf32> to vector<4x256xf32>
    %30 = arith.mulf %27, %29 : vector<4x256xf32>
    %31 = arith.addf %25, %30 : vector<4x256xf32>
    %c0_12 = arith.constant 0 : index
    %c0_13 = arith.constant 0 : index
    %c18 = arith.constant 18 : index
    %32 = vector.load %arg1[%c0_12, %c0_13, %c18] : memref<1x4x290xf32, #tpu.memory_space<vmem>>, vector<1x4x256xf32>
    %33 = vector.shape_cast %32 : vector<1x4x256xf32> to vector<4x256xf32>
    %34 = vector.extract_strided_slice %0 {offsets = [0, 5], sizes = [4, 1], strides = [1, 1]} : vector<4x9xf32> to vector<4x1xf32>
    %35 = vector.broadcast %34 : vector<4x1xf32> to vector<4x256xf32>
    %36 = arith.mulf %33, %35 : vector<4x256xf32>
    %37 = arith.addf %31, %36 : vector<4x256xf32>
    %c0_14 = arith.constant 0 : index
    %c0_15 = arith.constant 0 : index
    %c32 = arith.constant 32 : index
    %38 = vector.load %arg1[%c0_14, %c0_15, %c32] : memref<1x4x290xf32, #tpu.memory_space<vmem>>, vector<1x4x256xf32>
    %39 = vector.shape_cast %38 : vector<1x4x256xf32> to vector<4x256xf32>
    %40 = vector.extract_strided_slice %0 {offsets = [0, 6], sizes = [4, 1], strides = [1, 1]} : vector<4x9xf32> to vector<4x1xf32>
    %41 = vector.broadcast %40 : vector<4x1xf32> to vector<4x256xf32>
    %42 = arith.mulf %39, %41 : vector<4x256xf32>
    %43 = arith.addf %37, %42 : vector<4x256xf32>
    %c0_16 = arith.constant 0 : index
    %c0_17 = arith.constant 0 : index
    %c33 = arith.constant 33 : index
    %44 = vector.load %arg1[%c0_16, %c0_17, %c33] : memref<1x4x290xf32, #tpu.memory_space<vmem>>, vector<1x4x256xf32>
    %45 = vector.shape_cast %44 : vector<1x4x256xf32> to vector<4x256xf32>
    %46 = vector.extract_strided_slice %0 {offsets = [0, 7], sizes = [4, 1], strides = [1, 1]} : vector<4x9xf32> to vector<4x1xf32>
    %47 = vector.broadcast %46 : vector<4x1xf32> to vector<4x256xf32>
    %48 = arith.mulf %45, %47 : vector<4x256xf32>
    %49 = arith.addf %43, %48 : vector<4x256xf32>
    %c0_18 = arith.constant 0 : index
    %c0_19 = arith.constant 0 : index
    %c34 = arith.constant 34 : index
    %50 = vector.load %arg1[%c0_18, %c0_19, %c34] : memref<1x4x290xf32, #tpu.memory_space<vmem>>, vector<1x4x256xf32>
    %51 = vector.shape_cast %50 : vector<1x4x256xf32> to vector<4x256xf32>
    %52 = vector.extract_strided_slice %0 {offsets = [0, 8], sizes = [4, 1], strides = [1, 1]} : vector<4x9xf32> to vector<4x1xf32>
    %53 = vector.broadcast %52 : vector<4x1xf32> to vector<4x256xf32>
    %54 = arith.mulf %51, %53 : vector<4x256xf32>
    %55 = arith.addf %49, %54 : vector<4x256xf32>
    %c0_20 = arith.constant 0 : index
    %c0_21 = arith.constant 0 : index
    %56 = vector.load %arg3[%c0_20, %c0_21] : memref<4x1xf32, #tpu.memory_space<vmem>>, vector<4x1xf32>
    %57 = vector.broadcast %56 : vector<4x1xf32> to vector<4x256xf32>
    %58 = arith.addf %55, %57 : vector<4x256xf32>
    %c0_22 = arith.constant 0 : index
    %c0_23 = arith.constant 0 : index
    %59 = vector.load %arg4[%c0_22, %c0_23] : memref<8x4xf32, #tpu.memory_space<vmem>>, vector<8x4xf32>
    %cst_24 = arith.constant dense<0.000000e+00> : vector<8x256xf32>
    %60 = tpu.matmul %59, %58, %cst_24 {dimension_numbers = #tpu.dot_dimension_numbers<[1], [0], [0], [1], [0, 0, 1, 1], [], []>} : vector<8x4xf32>, vector<4x256xf32>, vector<8x256xf32> -> vector<8x256xf32>
    %c0_25 = arith.constant 0 : index
    %c0_26 = arith.constant 0 : index
    %61 = vector.load %arg5[%c0_25, %c0_26] : memref<8x1xf32, #tpu.memory_space<vmem>>, vector<8x1xf32>
    %62 = vector.broadcast %61 : vector<8x1xf32> to vector<8x256xf32>
    %63 = arith.addf %60, %62 : vector<8x256xf32>
    %c0_27 = arith.constant 0 : index
    %c0_28 = arith.constant 0 : index
    %c0_29 = arith.constant 0 : index
    %64 = vector.load %arg6[%c0_27, %c0_28, %c0_29] : memref<1x8x256xf32, #tpu.memory_space<vmem>>, vector<1x8x256xf32>
    %65 = vector.shape_cast %64 : vector<1x8x256xf32> to vector<8x256xf32>
    %66 = vector.shape_cast %63 : vector<8x256xf32> to vector<1x8x256xf32>
    tpu.vector_store %arg6[%c0_27, %c0_28, %c0_29], %66 {strides = array<i32>} : memref<1x8x256xf32, #tpu.memory_space<vmem>>, vector<1x8x256xf32>,
    return
  }
  func.func @transform_0(%arg0: i32) -> (i32, i32, i32) {
    %c0_i32 = arith.constant 0 : i32
    %c0_i32_0 = arith.constant 0 : i32
    %c0_i32_1 = arith.constant 0 : i32
    return %arg0, %c0_i32, %c0_i32_0 : i32, i32, i32
  }
  func.func @transform_1(%arg0: i32) -> (i32, i32) {
    %c0_i32 = arith.constant 0 : i32
    %c0_i32_0 = arith.constant 0 : i32
    %c0_i32_1 = arith.constant 0 : i32
    return %c0_i32, %c0_i32_0 : i32, i32
  }
  func.func @transform_2(%arg0: i32) -> (i32, i32) {
    %c0_i32 = arith.constant 0 : i32
    %c0_i32_0 = arith.constant 0 : i32
    %c0_i32_1 = arith.constant 0 : i32
    return %c0_i32, %c0_i32_0 : i32, i32
  }
  func.func @transform_3(%arg0: i32) -> (i32, i32) {
    %c0_i32 = arith.constant 0 : i32
    %c0_i32_0 = arith.constant 0 : i32
    %c0_i32_1 = arith.constant 0 : i32
    return %c0_i32, %c0_i32_0 : i32, i32
  }
  func.func @transform_4(%arg0: i32) -> (i32, i32) {
    %c0_i32 = arith.constant 0 : i32
    %c0_i32_0 = arith.constant 0 : i32
    %c0_i32_1 = arith.constant 0 : i32
    return %c0_i32, %c0_i32_0 : i32, i32
  }
  func.func @transform_5(%arg0: i32) -> (i32, i32, i32) {
    %c0_i32 = arith.constant 0 : i32
    %c0_i32_0 = arith.constant 0 : i32
    %c0_i32_1 = arith.constant 0 : i32
    return %arg0, %c0_i32, %c0_i32_0 : i32, i32, i32
  }
}

</mosaic_0001>

<bundles_post_ra>
// kernel: tpu_custom_call.1
= control target key start
LH: loop header
LB: loop body
LE: loop exit
PB: predicated region body
PF: predicated region fallthrough
CT: control target
= control target key end

     0   :  { %10 = vsyncpa [#allocation3], 0  ;;  %s1066_s0 = inlined_call_operand.vmem [shape: f32[2,4,290], index: 0, kind: input, shape index: {}]   ;;  %s1067_s1 = inlined_call_operand.hbm [shape: f32[4,9], index: 1, kind: input, shape index: {}]   ;;  %s1068_s2 = inlined_call_operand.vmem [shape: f32[4,1], index: 2, kind: input, shape index: {}]   ;;  %s1069_s3 = inlined_call_operand.vmem [shape: f32[8,4], index: 3, kind: input, shape index: {}]   ;;  %s1070_s4 = inlined_call_operand.vmem [shape: f32[8,1], index: 4, kind: input, shape index: {}]   ;;  %s1071_s5 = inlined_call_operand.hbm [shape: f32[2,8,256], index: 5, kind: output, shape index: {}]  }
   0x1   :  { %11 = vsyncpa [#allocation4], 0 }
   0x2   :  { %13 = vsyncpa [#allocation4 + $0x1], 0  ;;  %s897_s18 = smov 0   ;;  %s899_s19 = smov 0  }
   0x3   :  { %s901_s20 = smov 0   ;;  %s903_s21 = smov 0  }
   0x4 LB: > { %s918_s22 = sadd.s32 4294967295, %s844_s21   ;;  %s653_s23 = sadd.s32 4294967294, %s844_s21   ;;  %s844_s21 = sphi %s903_s21, %s1087_s21   ;;  %s840_s20 = sphi %s901_s20, %s1086_s20   ;;  %s836_s19 = sphi %s899_s19, %s1085_s19   ;;  %s832_s18 = sphi %s897_s18, %s1084_s18  }
   0x5   : > { %s922_s24 = sadd.s32 1, %s844_s21   ;;  %s136_s25 = sadd.s32 1, %s840_s20 }
   0x6   : > { %s133_s26 = ssub.s32 %s844_s21, %s922_s24  ;;  %p146_p0 = scmp.ne.s32.totalorder %s840_s20, %s836_s19 }
   0x7   : > { %p134_p1 = scmp.eq.s32.totalorder %s133_s26, 0  ;;  %p147_p2 = scmp.eq.s32.totalorder %s918_s22, 1 }
   0x8   : > { %p152_p3 = scmp.ne.s32.totalorder %s836_s19, %s832_s18  ;;  %p153_p4 = scmp.eq.s32.totalorder %s653_s23, 1 }
   0x9   : > { %s933_s27 = scalar_select %p134_p1, %s840_s20, %s136_s25  }
   0xa   : > { %p935_p5 = por %p147_p2, %p146_p0  ;;  %p939_p6 = por %p153_p4, %p152_p3 }
   0xb   : > { %p654_p7 = scmp.ge.s32.totalorder %s844_s21, 1  ;;  %p160_p8 = scmp.lt.s32.totalorder %s844_s21, 3 }
   0xc   : > { %s1075_s28 = scalar_select %p935_p5, 1, 0 }
   0xd   : > { %s1076_s29 = scalar_select %p939_p6, 1, 0 }
   0xe   : > { %p1072_p9 = scmp.eq.s32.totalorder %s918_s22, 0  ;;  %p946_p10 = pnand %p654_p7, %p160_p8 }
   0xf   : > { %s846_s6 = smov [#allocation2]   ;;  %s750_s11 = scalar_lea.hbm %s1067_s1, 64 }
  0x10   : > { %s1077_s30 = scalar_select %p946_p10, 1, 0 }
  0x11   : > { %s173_s7 = sshll.u32 %s846_s6, 4  ;;  %p677_p11 = pneg %p946_p10  ;;  %s174_s7 = int_to_ptr.vmem [resolvable:$true] %s173_s7 }
  0x12   : > { %p751_p13 = scmp.ne.s32.totalorder %s1067_s1, %s750_s11  ;;  %p757_p3 = scmp.lt.u32.totalorder %s750_s11, %s1067_s1 }
  0x13   : > { %p954_p12 = pnand %p1072_p9, %p677_p11 }
  0x15   : > { %p752_p0 = pneg %p954_p12 }
  0x17   : > { %p753_p1 = pnand %p752_p0, %p751_p13 }
  0x19   : > { %p754_p2 = pneg %p753_p1 }
  0x1b   : > { %p759_p4 = pnand %p757_p3, %p754_p2 }
  0x1d   : > { %762 = shalt.err (!%p759_p4)
}
  0x1e   : > { %s763_s16 = scalar_lea.vmem %s174_s7, 64  ;;  %p771_p9 = scmp.lt.s32.totalorder %s174_s7, %s174_s7 }
  0x1f   : > { %p764_p7 = scmp.ne.s32.totalorder %s174_s7, %s763_s16  ;;  %p772_p6 = scmp.lt.s32.totalorder %s763_s16, %s763_s16 }
  0x21   : > { %p766_p8 = pnand %p764_p7, %p752_p0  ;;  %p773_p5 = por %p772_p6, %p771_p9 }
  0x23   : > { %p767_p11 = pneg %p766_p8 }
  0x25   : > { %p774_p10 = pnand %p773_p5, %p767_p11 }
  0x27   : > { %777 = shalt.err (!%p774_p10)
}
  0x28   : > { %680 = dma.hbm_to_vmem [thread:$0]  (!%p954_p12), %s1067_s1, 64, %s174_s7, [#allocation3]  }
  0x29   : > { %p1079_p13 = scmp.ne.s32.totalorder %s1077_s30, 0 }
  0x2a   : > { %p1080_p1 = scmp.eq.s32.totalorder (!%p1079_p13), %s918_s22, 0 }
  0x2b   : > { %203 = sbr.rel (%p1079_p13) target bundleno = 573 (0x23d), region = 40 }
  0x32   : > { %823 = dma.done.wait (%p1080_p1), [#allocation3], 64   ;;  %p1081_p0 = pmov %p1080_p1 }
  0x33   : > { %v847_v0 = vmov 1   ;;  %v848_v1 = vmov 3   ;;  %v236_v2 = vld [vmem:[#allocation2] sm:$0xf]  ;;  %v849_v3 = vmov 2   ;;  %v850_v4 = vmov 4  }
  0x34   : > { %825 = vsyncadd (%p1081_p0), [#allocation3], 4294967232  ;;  %740 = vset.pattern.permute.xlu0 %v847_v0  ;;  %742 = vset.pattern.permute.xlu1 %v848_v1  ;;  %v851_v5 = vmov 5   ;;  %v852_v6 = vmov 6   ;;  %v853_v7 = vmov 7   ;;  %v854_v8 = vmov 0  }
  0x35   : > { %255 = vperm.xlu0 %740, %v236_v2   ;;  %308 = vperm.xlu1 %742, %v236_v2   ;;  %v463_v9 = vld [vmem:[%s1068_s2] sm:$0xf]  ;;  %v855_v10 = vmov 8   ;;  %p231_p5 = scmp.lt.s32.totalorder %s918_s22, 1  ;;  %v856_v11 = vmov 839922192   ;;  %v245_v13 = vlaneseq }
  0x36   : > { %v243_v12 = vunpack.c.l.s4 %v856_v11  ;;  %s857_s10 = smov 127   ;;  %s858_s11 = smov 126   ;;  %v865_v54 = vmov 0.0   ;;  %v478_v55 = vld [vmem:[%s1070_s4] sm:$0xff]  ;;  %vm275_vm0 = vcmask 1043456   ;;  %vm277_vm1 = vcmask 1039360  }
  0x37   : > { %s232_s30 = scalar_select %p231_p5, %s918_s22, 1  ;;  %v246_v15 = vshrl.u32 %v245_v13, 7  ;;  %558 = vmatprep.mubr.f32.mxu0 %v865_v54  ;;  %vm303_vm2 = vcmask 1031168   ;;  %vm329_vm3 = vcmask 916480   ;;  %vm355_vm4 = vcmask 908288  }
  0x38   : > { %v244_v14 = vunpack.c.0.s8 %v243_v12  ;;  %s859_s12 = smov 112   ;;  %s860_s13 = smov 111   ;;  %vm381_vm5 = vcmask 900096   ;;  %vm407_vm6 = vcmask 785408   ;;  %vm433_vm7 = vcmask 777216  }
  0x39   : > { %741 = vset.pattern.permute.xlu0 %v849_v3  ;;  %743 = vset.pattern.permute.xlu1 %v850_v4  ;;  %s670_s6 = smul.u32 12, %s232_s30  ;;  %s861_s14 = smov 110   ;;  %vm459_vm8 = vcmask 769024   ;;  %vm486_vm9 = vcmask 31744  }
  0x3a   : > { %282 = vperm.xlu0 %741, %v236_v2   ;;  %334 = vperm.xlu1 %743, %v236_v2   ;;  %v988_v16 = vsub.s32 %v244_v14, %v246_v15  ;;  %s862_s15 = smov 96   ;;  %s863_s16 = smov 95  }
  0x3b   : > { %s235_s9 = scalar_lea.vmem %s1066_s0, %s670_s6  ;;  %s864_s17 = smov 94  }
  0x3c   : > { %v252_v17 = vld [vmem:[%s235_s9] sm:$0xff]  ;;  %v253_v22 = vld [vmem:[%s235_s9 + $0x8] sm:$0xf]  ;;  %s228_s6 = sand.u32 1, %s836_s19   ;;  %s669_s8 = sshll.u32 %s918_s22, 8 }
  0x3d   : > { %s659_s7 = sshll.u32 %s228_s6, 4  ;;  %p1082_p9 = scmp.ne.s32.totalorder %s1075_s28, 0 }
  0x3e   : > { %744 = vset.pattern.permute.xlu1 %v851_v5  ;;  %745 = vset.pattern.permute.xlu0 %v852_v6  ;;  %s230_s9 = scalar_lea.vmem [#allocation5], %s659_s7 }
  0x3f   : > { %360 = vperm.xlu1 %744, %v236_v2   ;;  %386 = vperm.xlu0 %745, %v236_v2  }
  0x43   : > { %746 = vset.pattern.permute.xlu1 %v853_v7  ;;  %748 = vset.pattern.permute.xlu0 %v854_v8 }
  0x44   : > { %412 = vperm.xlu1 %746, %v236_v2   ;;  %240 = vperm.xlu0 %748, %v236_v2  }
  0x48   : > { %747 = vset.pattern.permute.xlu1 %v855_v10  ;;  %466 = vperm.xlu0 %748, %v463_v9  }
  0x49   : > { %438 = vperm.xlu1 %747, %v236_v2  }
  0x4d   : > { %749 = vset.pattern.permute.xlu1 %v854_v8 }
  0xb4   : > { %v256_v18 = vpop.permute.xlu0 %255  ;;  %v309_v19 = vpop.permute.xlu1 %308 }
  0xb5   : > { %v263_v20 = vrot.slane %v256_v18, %v988_v16  ;;  %v316_v26 = vrot.slane %v309_v19, %v988_v16 }
  0xb7   : > { %v265_v21 = vmul.f32 %v263_v20, %v252_v17  ;;  %v266_v27 = vmul.f32 %v263_v20, %v253_v22  ;;  %v318_v30 = vmul.f32 %v316_v26, %v252_v17  ;;  %v319_v36 = vmul.f32 %v316_v26, %v253_v22 }
  0xb9   : > { %269 = vrot.lane.b32.xlu1 %v265_v21, %s857_s10  ;;  %v283_v23 = vpop.permute.xlu0 %282  ;;  %v335_v24 = vpop.permute.xlu1 %334 }
  0xba   : > { %v290_v25 = vrot.slane %v283_v23, %v988_v16  ;;  %v342_v31 = vrot.slane %v335_v24, %v988_v16 }
  0xbc   : > { %v292_v28 = vmul.f32 %v290_v25, %v252_v17  ;;  %v293_v29 = vmul.f32 %v290_v25, %v253_v22  ;;  %v344_v34 = vmul.f32 %v342_v31, %v252_v17  ;;  %v345_v39 = vmul.f32 %v342_v31, %v253_v22 }
  0xbd   : > { %271 = vrot.lane.b32.xlu1 %v266_v27, %s857_s10  ;;  %s582_s10 = sshll.u32 %s230_s9, 4  ;;  %s1026_s10 = int_to_ptr.vmem [resolvable:$true] %s582_s10 }
  0xbe   : > { %296 = vrot.lane.b32.xlu0 %v292_v28, %s858_s11  ;;  %v361_v32 = vpop.permute.xlu1 %360  ;;  %v387_v33 = vpop.permute.xlu0 %386  ;;  %s778_s22 = scalar_lea.vmem %s1026_s10, 256 }
  0xbf   : > { %v368_v35 = vrot.slane %v361_v32, %v988_v16  ;;  %v394_v42 = vrot.slane %v387_v33, %v988_v16  ;;  %p779_p6 = scmp.ne.s32.totalorder %s1026_s10, %s778_s22 }
  0xc1   : > { %298 = vrot.lane.b32.xlu1 %v293_v29, %s858_s11  ;;  %v370_v41 = vmul.f32 %v368_v35, %v252_v17  ;;  %v371_v44 = vmul.f32 %v368_v35, %v253_v22  ;;  %v396_v45 = vmul.f32 %v394_v42, %v252_v17  ;;  %v397_v48 = vmul.f32 %v394_v42, %v253_v22  ;;  %p780_p10 = pnand %p779_p6, %p1082_p9 }
  0xc2   : > { %322 = vrot.lane.b32.xlu0 %v318_v30, %s859_s12 }
  0xc3   : > { %v241_v37 = vpop.permute.xlu0 %240  ;;  %v413_v40 = vpop.permute.xlu1 %412  ;;  %p781_p12 = pneg %p780_p10 }
  0xc4   : > { %v248_v38 = vrot.slane %v241_v37, %v988_v16  ;;  %v420_v46 = vrot.slane %v413_v40, %v988_v16 }
  0xc5   : > { %324 = vrot.lane.b32.xlu1 %v319_v36, %s859_s12 }
  0xc6   : > { %348 = vrot.lane.b32.xlu0 %v344_v34, %s860_s13  ;;  %v250_v43 = vmul.f32 %v252_v17, %v248_v38  ;;  %v423_v49 = vmul.f32 %v420_v46, %v253_v22  ;;  %v422_v51 = vmul.f32 %v420_v46, %v252_v17 }
  0xc7   : > { %v1002_v57 = vpop.permute.xlu0 %466 }
  0xc8   : > { %v439_v47 = vpop.permute.xlu1 %438 }
  0xc9   : > { %350 = vrot.lane.b32.xlu1 %v345_v39, %s860_s13  ;;  %v446_v50 = vrot.slane %v439_v47, %v988_v16  ;;  %s1024_s13 = scalar_lea.hbm %s1071_s5, %s669_s8 }
  0xca   : > { %374 = vrot.lane.b32.xlu0 %v370_v41, %s861_s14 }
  0xcb   : > { %v449_v52 = vmul.f32 %v446_v50, %v253_v22  ;;  %v448_v53 = vmul.f32 %v446_v50, %v252_v17 }
  0xcd   : > { %376 = vrot.lane.b32.xlu1 %v371_v44, %s861_s14  ;;  %s568_s14 = scalar_lea.sflag [#allocation4], %s228_s6 }
  0xce   : > { %400 = vrot.lane.b32.xlu0 %v396_v45, %s862_s15 }
  0xd1   : > { %402 = vrot.lane.b32.xlu1 %v397_v48, %s862_s15  ;;  %s866_s15 = smov [#allocation5]  }
  0xd2   : > { %428 = vrot.lane.b32.xlu0 %v423_v49, %s863_s16  ;;  %v474_v49 = vrot.slane %v1002_v57, %v988_v16 }
  0xd5   : > { %426 = vrot.lane.b32.xlu1 %v422_v51, %s863_s16  ;;  %s782_s16 = sshll.u32 %s866_s15, 4  ;;  %s783_s16 = int_to_ptr.vmem [resolvable:$false] %s782_s16 }
  0xd6   : > { %454 = vrot.lane.b32.xlu0 %v449_v52, %s864_s17  ;;  %p785_p2 = scmp.lt.s32.totalorder %s1026_s10, %s783_s16 }
  0xd9   : > { %452 = vrot.lane.b32.xlu1 %v448_v53, %s864_s17  ;;  %v477_v53 = vld [vmem:[%s1069_s3] sm:$0xff]  ;;  %s784_s17 = scalar_lea.vmem %s783_s16, 512 }
  0xda   : > { %p786_p3 = scmp.lt.s32.totalorder %s784_s17, %s778_s22 }
  0xdc   : > { %p787_p4 = por %p786_p3, %p785_p2 }
  0xdd   : > { %481 = vperm.xlu1 %749, %v478_v55  }
  0xde   : > { %p788_p7 = pnand %p787_p4, %p781_p12 }
 0x12b   : > { %v270_v56 = vpop.permute.xlu1 %269 }
 0x12c   : > { %v273_v1 = vrot.slane %v270_v56, 4 }
 0x12f   : > { %v272_v58 = vpop.permute.xlu1 %271 }
 0x130   : > { %v297_v59 = vpop.permute.xlu0 %296  ;;  %v274_v63 = vrot.slane %v272_v58, 4 }
 0x131   : > { %v300_v2 = vrot.slane %v297_v59, 4 }
 0x132   : > { %v276_v5 = vsel %vm275_vm0, %v273_v1, %v274_v63 }
 0x133   : > { %v299_v60 = vpop.permute.xlu1 %298  ;;  %v278_v12 = vsel %vm277_vm1, %v270_v56, %v276_v5 }
 0x134   : > { %v323_v61 = vpop.permute.xlu0 %322  ;;  %v301_v3 = vrot.slane %v299_v60, 4  ;;  %v280_v20 = vadd.f32 %v278_v12, %v250_v43 }
 0x135   : > { %v326_v9 = vrot.slane %v323_v61, 4 }
 0x136   : > { %v302_v8 = vsel %vm275_vm0, %v300_v2, %v301_v3 }
 0x137   : > { %v325_v62 = vpop.permute.xlu1 %324  ;;  %v304_v19 = vsel %vm303_vm2, %v297_v59, %v302_v8 }
 0x138   : > { %v349_v0 = vpop.permute.xlu0 %348  ;;  %v327_v6 = vrot.slane %v325_v62, 4  ;;  %v306_v25 = vadd.f32 %v304_v19, %v280_v20 }
 0x139   : > { %v352_v10 = vrot.slane %v349_v0, 4 }
 0x13a   : > { %v328_v14 = vsel %vm275_vm0, %v326_v9, %v327_v6 }
 0x13b   : > { %v351_v4 = vpop.permute.xlu1 %350  ;;  %v330_v23 = vsel %vm329_vm3, %v323_v61, %v328_v14 }
 0x13c   : > { %v375_v7 = vpop.permute.xlu0 %374  ;;  %v353_v11 = vrot.slane %v351_v4, 4  ;;  %v332_v30 = vadd.f32 %v330_v23, %v306_v25 }
 0x13d   : > { %v378_v15 = vrot.slane %v375_v7, 4 }
 0x13e   : > { %v354_v21 = vsel %vm275_vm0, %v352_v10, %v353_v11 }
 0x13f   : > { %v377_v13 = vpop.permute.xlu1 %376  ;;  %v356_v29 = vsel %vm355_vm4, %v349_v0, %v354_v21 }
 0x140   : > { %v379_v17 = vrot.slane %v377_v13, 4  ;;  %v401_v18 = vpop.permute.xlu0 %400  ;;  %v358_v35 = vadd.f32 %v356_v29, %v332_v30 }
 0x141   : > { %v404_v22 = vrot.slane %v401_v18, 4 }
 0x142   : > { %v380_v26 = vsel %vm275_vm0, %v378_v15, %v379_v17 }
 0x143   : > { %v403_v24 = vpop.permute.xlu1 %402  ;;  %v382_v33 = vsel %vm381_vm5, %v375_v7, %v380_v26 }
 0x144   : > { %v405_v27 = vrot.slane %v403_v24, 4  ;;  %v429_v28 = vpop.permute.xlu0 %428  ;;  %v384_v39 = vadd.f32 %v382_v33, %v358_v35 }
 0x145   : > { %v431_v32 = vrot.slane %v429_v28, 4 }
 0x146   : > { %v406_v31 = vsel %vm275_vm0, %v404_v22, %v405_v27 }
 0x147   : > { %v427_v34 = vpop.permute.xlu1 %426  ;;  %v408_v38 = vsel %vm407_vm6, %v401_v18, %v406_v31 }
 0x148   : > { %v430_v36 = vrot.slane %v427_v34, 4  ;;  %v455_v37 = vpop.permute.xlu0 %454  ;;  %v410_v44 = vadd.f32 %v408_v38, %v384_v39 }
 0x149   : > { %v457_v41 = vrot.slane %v455_v37, 4 }
 0x14a   : > { %v432_v40 = vsel %vm275_vm0, %v430_v36, %v431_v32 }
 0x14b   : > { %v434_v42 = vsel %vm433_vm7, %v427_v34, %v432_v40  ;;  %v453_v43 = vpop.permute.xlu1 %452 }
 0x14c   : > { %v456_v45 = vrot.slane %v453_v43, 4  ;;  %v436_v46 = vadd.f32 %v434_v42, %v410_v44 }
 0x14e   : > { %v458_v47 = vsel %vm275_vm0, %v456_v45, %v457_v41 }
 0x14f   : > { %v460_v48 = vsel %vm459_vm8, %v453_v43, %v458_v47 }
 0x150   : > { %v462_v50 = vadd.f32 %v460_v48, %v436_v46 }
 0x152   : > { %v476_v51 = vadd.f32 %v474_v49, %v462_v50 }
 0x154   : > { %v485_v52 = vcombine.high %v476_v51, %v476_v51 }
 0x156   : > { %661 = vmatprep.subr.msk.mxu0 %vm275_vm0, %v485_v52 }
 0x157   : > { %662 = vmatpush1.msk.msra.mxu0 %vm275_vm0, %v476_v51 }
 0x158   : > { %663 = vmatmul.mubr.msk.f32.vlgmr.msra.gmra.mrb[0].mxu0 %vm486_vm9, %v477_v53 }
 0x15c   : > { %v482_v54 = vpop.permute.xlu1 %481 }
 0x22b   : > { %v560_v16 = vpop.f32.mrb[0].mxu0 }
 0x22c   : > { %v561_v55 = vadd.f32 %v560_v16, %v482_v54  ;;  %v562_v56 = vpop.f32.mrb[1].mxu0 }
 0x22d   : > { %v563_v57 = vadd.f32 %v562_v56, %v482_v54 }
 0x22e   : > { %565 = vst [vmem:[%s230_s9] sm:$0xff] %v561_v55 }
 0x22f   : > { %566 = vst [vmem:[%s230_s9 + $0x8] sm:$0xff] %v563_v57 }
 0x230   : > { %791 = shalt.err (!%p788_p7)
}
 0x231   : > { %s792_s23 = scalar_lea.hbm %s1024_s13, 256  ;;  %s796_s30 = scalar_lea.hbm %s1071_s5, 512 }
 0x232   : > { %p793_p8 = scmp.ne.s32.totalorder %s1024_s13, %s792_s23  ;;  %p797_p1 = scmp.lt.u32.totalorder %s1024_s13, %s1071_s5 }
 0x233   : > { %p798_p0 = scmp.lt.u32.totalorder %s796_s30, %s792_s23  ;;  %p800_p6 = scmp.lt.u32.totalorder %s792_s23, %s1024_s13 }
 0x234   : > { %p794_p11 = pnand %p793_p8, %p1082_p9 }
 0x235   : > { %p799_p5 = por %p798_p0, %p797_p1 }
 0x236   : > { %p795_p13 = pneg %p794_p11 }
 0x237   : > { %p801_p10 = por %p800_p6, %p799_p5 }
 0x239   : > { %p802_p12 = pnand %p801_p10, %p795_p13 }
 0x23b   : > { %805 = shalt.err (!%p802_p12)
}
 0x23c   : > { %675 = dma.vmem_to_hbm [thread:$0]  (%p1082_p9), %s1026_s10, 256, %s1024_s13, %s568_s14  }
 0x23d PF: > { %p687_p2 = scmp.ge.s32.totalorder %s844_s21, 2  ;;  %s594_s8 = sand.u32 1, %s832_s18  }
 0x23e   : > { %p1083_p3 = scmp.ne.s32.totalorder %s1076_s29, 0  ;;  %s595_s9 = scalar_lea.sflag [#allocation4], %s594_s8 }
 0x240   : > { %p682_p4 = pnand %p687_p2, %p1083_p3 }
 0x242   : > { %827 = dma.done.wait (!%p682_p4), %s595_s9, 256  }
 0x243   : > { %829 = vsyncadd (!%p682_p4), %s595_s9, 4294967040  ;;  %p16_p7 = scmp.ge.s32.totalorder %s922_s24, 4   ;;  %s1084_s18 = smov %s836_s19 }
 0x244   : > { %s1085_s19 = smov %s840_s20  ;;  %s1086_s20 = smov %s933_s27 }
 0x245   : > { %s1087_s21 = smov %s922_s24  ;;  %18 = sbr.rel (!%p16_p7) target bundleno = 4 (0x4), region = 80 }
 0x24c   :  { %600 = vsyncpa [#allocation3], 1 }
 0x24d   :  { %602 = vsyncpa [#allocation3 + $0x1], 1 }
 0x24e   :  { %603 = vsyncpa [#allocation4], 1 }
 0x24f   :  { %605 = vsyncpa [#allocation4 + $0x1], 1 }

</bundles_post_ra>
